<compile_context>
chip_gen: v6e
topology: v6e:2x2x1
jax: 0.10.0
libtpu: 0.0.40
codegen_flags: <defaults>
</compile_context>

<pallas_src>
import functools
from typing import NamedTuple

import jax
import jax.numpy as jnp
from jax.experimental import pallas as pl
from jax.experimental.pallas import tpu as pltpu


def _round_up(x, m):
    return ((x + m - 1) // m) * m


def _cdiv(a, b):
    return -(-a // b)


def _tpu_hw_info():
    """(vmem_capacity_bytes, is_v5) with conservative fallbacks."""
    vmem_cap = 64 * 1024 * 1024          # conservative fallback (v7x per-TC)
    is_v5 = False
    try:
        info = pltpu.get_tpu_info()
        vmem_cap = int(getattr(info, "vmem_capacity_bytes", vmem_cap))
    except Exception:
        pass
    try:
        kind = jax.devices()[0].device_kind.lower()
        is_v5 = "v5" in kind
    except Exception:
        pass
    return vmem_cap, is_v5


class PackedWeights(NamedTuple):
    w2: jax.Array        # (F_pad, C * O_pad)  matmul dtype
    bias: jax.Array      # (1, O_pad)          float32
    n_classes: int
    n_clusters: int
    n_features: int
    o_pad: int
    f_pad: int


def pack_bilinear_weights(W, bias, *, matmul_dtype=jnp.bfloat16):
    """Repack nn.Bilinear weights for the kernel.

    Call once per weight set and reuse across forward calls (the repack is a
    full HBM read+write of W and would otherwise dominate small-batch calls).
    W: (O, C, F), bias: (O,).
    """
    O, C, F = W.shape
    f_pad = _round_up(max(F, 1), 128)
    o_pad = _round_up(max(O, 1), 128)
    w_t = jnp.transpose(W.astype(jnp.float32), (2, 1, 0))          # (F, C, O)
    w_p = jnp.zeros((f_pad, C, o_pad), jnp.float32).at[:F, :, :O].set(w_t)
    w2 = w_p.reshape(f_pad, C * o_pad).astype(matmul_dtype)
    b_p = jnp.zeros((1, o_pad), jnp.float32).at[0, :O].set(bias.astype(jnp.float32))
    return PackedWeights(w2=w2, bias=b_p, n_classes=O, n_clusters=C,
                         n_features=F, o_pad=o_pad, f_pad=f_pad)


def _bilinear_onehot_kernel(z_ref, x_ref, w_ref, b_ref, out_ref, *,
                            o_pad, n_clusters, chunk_clusters):
    """Fused one-hot-select + bilinear form for one batch tile.

    z_ref : (TB, 1)            int32   cluster index per row
    x_ref : (TB, F_pad)        bf16    features (zero padded)
    w_ref : (F_pad, C * O_pad) bf16    repacked bilinear weight (resident)
    b_ref : (1, O_pad)         f32     bias (zero padded, resident)
    out   : (TB, O_pad)        f32     logits (lane-dense)
    """
    x = x_ref[...]                              # single load, reused per chunk
    z = z_ref[...]                              # (TB, 1) int32
    acc = jnp.zeros(out_ref.shape, jnp.float32)

    # Chunk the N dimension of the wide dot: keeps the f32 temp bounded at
    # TB*chunk_n*4 bytes and matches MXU column width (256 v6e/v7x, 128 v5e).
    c0 = 0
    while c0 < n_clusters:
        cc = min(chunk_clusters, n_clusters - c0)
        s = jnp.dot(x, w_ref[:, c0 * o_pad:(c0 + cc) * o_pad],
                    preferred_element_type=jnp.float32)     # (TB, cc*O_pad)
        for j in range(cc):
            blk = s[:, j * o_pad:(j + 1) * o_pad]            # (TB, O_pad)
            # Select-into-accumulator: 2 VPU ops per vreg per cluster
            # (cmp + select), no add — exactly one cluster matches per row.
            acc = jnp.where(z == (c0 + j), blk, acc)
        c0 += cc

    out_ref[...] = acc + b_ref[...]

    # TODO(synk): for large n_clusters, switch to a sorted grouped-matmul
    # (PrefetchScalarGridSpec over per-cluster row offsets) to avoid the Cx
    # padded-FLOP blow-up entirely.


def gold_latent_classifier_forward(X, z, W=None, bias=None, *, packed=None,
                                   tile_b=None, matmul_dtype=jnp.bfloat16,
                                   interpret=False):
    """Pallas-backed equivalent of GoldLatentClassifier.forward(X, z).

    X    : (B, F) float32
    z    : (B,)   int32      (values in [0, n_clusters))
    W    : (O, C, F) float32 (nn.Bilinear weight)   -- or pass `packed=`
    bias : (O,)   float32    (nn.Bilinear bias)
    returns (y_hat, z) with y_hat: (B, O) float32
    """
    if packed is None:
        assert W is not None and bias is not None
        packed = pack_bilinear_weights(W, bias, matmul_dtype=matmul_dtype)

    B, F = X.shape
    O, C = packed.n_classes, packed.n_clusters
    assert F == packed.n_features
    f_pad, o_pad = packed.f_pad, packed.o_pad
    x_bytes = jnp.dtype(packed.w2.dtype).itemsize

    # ---- generation-aware VMEM budget ---------------------------------------
    vmem_cap, is_v5 = _tpu_hw_info()
    # ~96 MiB on v5e/v6e (128 MiB VMEM), ~48 MiB on v7x (64 MiB per TC).
    vmem_limit = max(16 * 1024 * 1024,
                     min(int(vmem_cap * 0.75), 100 * 1024 * 1024))

    # N per MXU dot: 2 clusters (256 lanes) on v6e/v7x, 1 cluster (128) on v5e.
    target_n = 128 if is_v5 else 256
    chunk_clusters = max(1, min(C, target_n // o_pad))
    chunk_n = chunk_clusters * o_pad

    # ---- derive batch tile from the budget ----------------------------------
    w2_bytes = f_pad * C * o_pad * x_bytes
    resident = 2 * (w2_bytes + o_pad * 4)          # W2 + bias (counted 2x, see TODO)
    per_row = (2 * f_pad * x_bytes                 # X tile, double buffered
               + 2 * 128 * 4                       # z tile (lane padded), double buffered
               + 2 * o_pad * 4                     # out tile, double buffered
               + (chunk_n + 2 * o_pad) * 4)        # S chunk + acc + headroom
    budget = vmem_limit - resident
    tile_cap = 2048 if tile_b is None else max(8, _round_up(int(tile_b), 8))
    tb = max(8, min(tile_cap, (max(budget, 0) // per_row) // 8 * 8))
    tb = min(tb, _round_up(B, 8))

    n_tiles = _cdiv(B, tb)
    # Keep >= 2 batch tiles for non-trivial B so v7x's two TCs both get work.
    if n_tiles == 1 and B >= 128:
        n_tiles = 2
    # Rebalance so the last tile isn't mostly padding (e.g. B=520 w/ tb=512).
    tb = _round_up(_cdiv(B, n_tiles), 8)
    b_pad = n_tiles * tb

    # Make sure the scoped limit covers the chosen configuration.
    vmem_need = resident + tb * per_row + (2 << 20)
    vmem_limit = int(min(max(vmem_limit, vmem_need), int(vmem_cap * 0.9)))
    # TODO(synk): if W2 is too large to stay resident (v7x), add an 'arbitrary'
    # grid axis over clusters (or single-buffer W2/bias via
    # pipeline_mode=pl.Buffered(1), and Buffered(3) on X when F-DMA-bound).

    # ---- pad streaming operands (layout plumbing, not compute) --------------
    x_p = (jnp.zeros((b_pad, f_pad), jnp.float32)
           .at[:B, :F].set(X.astype(jnp.float32))
           .astype(packed.w2.dtype))
    z_p = (jnp.zeros((b_pad, 1), jnp.int32)
           .at[:B, 0].set(z.astype(jnp.int32)))     # padded rows -> 0, sliced off

    kernel = functools.partial(_bilinear_onehot_kernel,
                               o_pad=o_pad, n_clusters=C,
                               chunk_clusters=chunk_clusters)

    cost = pl.CostEstimate(
        flops=2 * b_pad * f_pad * C * o_pad,
        transcendentals=0,
        bytes_accessed=int(b_pad * f_pad * x_bytes       # X
                           + w2_bytes                     # W2
                           + b_pad * 4                    # z
                           + o_pad * 4                    # bias
                           + b_pad * o_pad * 4),          # out
    )

    y_pad = pl.pallas_call(
        kernel,
        out_shape=jax.ShapeDtypeStruct((b_pad, o_pad), jnp.float32),
        grid=(n_tiles,),
        in_specs=[
            pl.BlockSpec((tb, 1), lambda i: (i, 0)),             # z tile
            pl.BlockSpec((tb, f_pad), lambda i: (i, 0)),         # X tile
            pl.BlockSpec((f_pad, C * o_pad), lambda i: (0, 0)),  # W2 resident
            pl.BlockSpec((1, o_pad), lambda i: (0, 0)),          # bias resident
        ],
        out_specs=pl.BlockSpec((tb, o_pad), lambda i: (i, 0)),
        compiler_params=pltpu.CompilerParams(
            dimension_semantics=("parallel",),
            vmem_limit_bytes=vmem_limit,
        ),
        cost_estimate=cost,
        interpret=interpret,
    )(z_p, x_p, packed.w2, packed.bias)

    return y_pad[:B, :O], z


def init_params(key, n_features, n_clusters, n_classes):
    """Deterministic init mimicking nn.Bilinear: U(-k, k), k = 1/sqrt(in1)."""
    kw, kb = jax.random.split(key)
    bound = 1.0 / jnp.sqrt(jnp.float32(n_clusters))
    W = jax.random.uniform(kw, (n_classes, n_clusters, n_features),
                           dtype=jnp.float32, minval=-bound, maxval=bound)
    bias = jax.random.uniform(kb, (n_classes,),
                              dtype=jnp.float32, minval=-bound, maxval=bound)
    return W, bias


if __name__ == "__main__":
    # Small, deterministic example shapes.
    batch, n_features, n_clusters, n_classes = 8, 32, 4, 5

    key = jax.random.PRNGKey(0)
    kx, kz, kp = jax.random.split(key, 3)

    X = jax.random.normal(kx, (batch, n_features), dtype=jnp.float32)
    z = jax.random.randint(kz, (batch,), 0, n_clusters, dtype=jnp.int32)
    W, bias = init_params(kp, n_features, n_clusters, n_classes)

    # Repack once (weights are reusable across calls), then run the kernel.
    packed = pack_bilinear_weights(W, bias)
    y_hat, z_out = gold_latent_classifier_forward(X, z, packed=packed)
    y_hat = jax.block_until_ready(y_hat)

    # Reference applies the same bf16 rounding to the MXU operands (kernel
    # accumulates in f32), so a tight tolerance is valid.
    z1h_ref = jax.nn.one_hot(z, n_clusters, dtype=jnp.float32)
    x_r = X.astype(jnp.bfloat16).astype(jnp.float32)
    w_r = W.astype(jnp.bfloat16).astype(jnp.float32)
    y_ref = jnp.einsum('bc,ocf,bf->bo', z1h_ref, w_r, x_r,
                       precision=jax.lax.Precision.HIGHEST) + bias

    assert y_hat.shape == (batch, n_classes)
    assert jnp.allclose(y_hat, y_ref, atol=1e-4, rtol=1e-4), \
        float(jnp.max(jnp.abs(y_hat - y_ref)))
    assert jnp.array_equal(z_out, z)

    print("KERNEL_OK")
</pallas_src>

<mosaic_0001>
module attributes {stable_mosaic.version = 11 : i64} {
  func.func @_bilinear_onehot_kernel(%arg0: i32, %arg1: memref<8x1xi32, #tpu.memory_space<vmem>>, %arg2: memref<8x128xbf16, #tpu.memory_space<vmem>>, %arg3: memref<128x512xbf16, #tpu.memory_space<vmem>>, %arg4: memref<1x128xf32, #tpu.memory_space<vmem>>, %arg5: memref<8x128xf32, #tpu.memory_space<vmem>>) attributes {dimension_semantics = [#tpu.dimension_semantics<parallel>], iteration_bounds = array<i64: 1>, scalar_prefetch = 0 : i64, scratch_operands = 0 : i64, tpu.core_type = #tpu.core_type<tc>, window_params = [{transform_indices = @transform_0, window_bounds = array<i64: 8, 1>}, {transform_indices = @transform_1, window_bounds = array<i64: 8, 128>}, {pipeline_mode = #tpu.pipeline_mode<synchronous>, transform_indices = @transform_2, window_bounds = array<i64: 128, 512>}, {pipeline_mode = #tpu.pipeline_mode<synchronous>, transform_indices = @transform_3, window_bounds = array<i64: 1, 128>}, {transform_indices = @transform_4, window_bounds = array<i64: 8, 128>}]} {
    %c0 = arith.constant 0 : index
    %c0_0 = arith.constant 0 : index
    %0 = vector.load %arg2[%c0, %c0_0] : memref<8x128xbf16, #tpu.memory_space<vmem>>, vector<8x128xbf16>
    %c0_1 = arith.constant 0 : index
    %c0_2 = arith.constant 0 : index
    %1 = vector.load %arg1[%c0_1, %c0_2] : memref<8x1xi32, #tpu.memory_space<vmem>>, vector<8x1xi32>
    %cst = arith.constant 0.000000e+00 : f32
    %2 = vector.broadcast %cst : f32 to vector<8x128xf32>
    %c0_3 = arith.constant 0 : index
    %c0_4 = arith.constant 0 : index
    %3 = vector.load %arg3[%c0_3, %c0_4] : memref<128x512xbf16, #tpu.memory_space<vmem>>, vector<128x256xbf16>
    %cst_5 = arith.constant dense<0.000000e+00> : vector<8x256xf32>
    %4 = tpu.matmul %0, %3, %cst_5 {dimension_numbers = #tpu.dot_dimension_numbers<[1], [0], [0], [1], [0, 0, 1, 1], [], []>} : vector<8x128xbf16>, vector<128x256xbf16>, vector<8x256xf32> -> vector<8x256xf32>
    %5 = vector.extract_strided_slice %4 {offsets = [0, 0], sizes = [8, 128], strides = [1, 1]} : vector<8x256xf32> to vector<8x128xf32>
    %c0_i32 = arith.constant 0 : i32
    %6 = vector.broadcast %c0_i32 : i32 to vector<8x1xi32>
    %7 = arith.cmpi eq, %1, %6 : vector<8x1xi32>
    %8 = vector.shape_cast %7 : vector<8x1xi1> to vector<8x1xi1>
    %9 = vector.broadcast %8 : vector<8x1xi1> to vector<8x128xi1>
    %10 = arith.select %9, %5, %2 : vector<8x128xi1>, vector<8x128xf32>
    %11 = vector.extract_strided_slice %4 {offsets = [0, 128], sizes = [8, 128], strides = [1, 1]} : vector<8x256xf32> to vector<8x128xf32>
    %c1_i32 = arith.constant 1 : i32
    %12 = vector.broadcast %c1_i32 : i32 to vector<8x1xi32>
    %13 = arith.cmpi eq, %1, %12 : vector<8x1xi32>
    %14 = vector.shape_cast %13 : vector<8x1xi1> to vector<8x1xi1>
    %15 = vector.broadcast %14 : vector<8x1xi1> to vector<8x128xi1>
    %16 = arith.select %15, %11, %10 : vector<8x128xi1>, vector<8x128xf32>
    %c0_6 = arith.constant 0 : index
    %c256 = arith.constant 256 : index
    %17 = vector.load %arg3[%c0_6, %c256] : memref<128x512xbf16, #tpu.memory_space<vmem>>, vector<128x256xbf16>
    %cst_7 = arith.constant dense<0.000000e+00> : vector<8x256xf32>
    %18 = tpu.matmul %0, %17, %cst_7 {dimension_numbers = #tpu.dot_dimension_numbers<[1], [0], [0], [1], [0, 0, 1, 1], [], []>} : vector<8x128xbf16>, vector<128x256xbf16>, vector<8x256xf32> -> vector<8x256xf32>
    %19 = vector.extract_strided_slice %18 {offsets = [0, 0], sizes = [8, 128], strides = [1, 1]} : vector<8x256xf32> to vector<8x128xf32>
    %c2_i32 = arith.constant 2 : i32
    %20 = vector.broadcast %c2_i32 : i32 to vector<8x1xi32>
    %21 = arith.cmpi eq, %1, %20 : vector<8x1xi32>
    %22 = vector.shape_cast %21 : vector<8x1xi1> to vector<8x1xi1>
    %23 = vector.broadcast %22 : vector<8x1xi1> to vector<8x128xi1>
    %24 = arith.select %23, %19, %16 : vector<8x128xi1>, vector<8x128xf32>
    %25 = vector.extract_strided_slice %18 {offsets = [0, 128], sizes = [8, 128], strides = [1, 1]} : vector<8x256xf32> to vector<8x128xf32>
    %c3_i32 = arith.constant 3 : i32
    %26 = vector.broadcast %c3_i32 : i32 to vector<8x1xi32>
    %27 = arith.cmpi eq, %1, %26 : vector<8x1xi32>
    %28 = vector.shape_cast %27 : vector<8x1xi1> to vector<8x1xi1>
    %29 = vector.broadcast %28 : vector<8x1xi1> to vector<8x128xi1>
    %30 = arith.select %29, %25, %24 : vector<8x128xi1>, vector<8x128xf32>
    %c0_8 = arith.constant 0 : index
    %c0_9 = arith.constant 0 : index
    %31 = vector.load %arg4[%c0_8, %c0_9] : memref<1x128xf32, #tpu.memory_space<vmem>>, vector<1x128xf32>
    %32 = vector.broadcast %31 : vector<1x128xf32> to vector<8x128xf32>
    %33 = arith.addf %30, %32 : vector<8x128xf32>
    %c0_10 = arith.constant 0 : index
    %c0_11 = arith.constant 0 : index
    %34 = vector.load %arg5[%c0_10, %c0_11] : memref<8x128xf32, #tpu.memory_space<vmem>>, vector<8x128xf32>
    tpu.vector_store %arg5[%c0_10, %c0_11], %33 {strides = array<i32>} : memref<8x128xf32, #tpu.memory_space<vmem>>, vector<8x128xf32>,
    return
  }
  func.func @transform_0(%arg0: i32) -> (i32, i32) {
    %c0_i32 = arith.constant 0 : i32
    %c0_i32_0 = arith.constant 0 : i32
    return %arg0, %c0_i32 : i32, i32
  }
  func.func @transform_1(%arg0: i32) -> (i32, i32) {
    %c0_i32 = arith.constant 0 : i32
    %c0_i32_0 = arith.constant 0 : i32
    return %arg0, %c0_i32 : i32, i32
  }
  func.func @transform_2(%arg0: i32) -> (i32, i32) {
    %c0_i32 = arith.constant 0 : i32
    %c0_i32_0 = arith.constant 0 : i32
    %c0_i32_1 = arith.constant 0 : i32
    return %c0_i32, %c0_i32_0 : i32, i32
  }
  func.func @transform_3(%arg0: i32) -> (i32, i32) {
    %c0_i32 = arith.constant 0 : i32
    %c0_i32_0 = arith.constant 0 : i32
    %c0_i32_1 = arith.constant 0 : i32
    return %c0_i32, %c0_i32_0 : i32, i32
  }
  func.func @transform_4(%arg0: i32) -> (i32, i32) {
    %c0_i32 = arith.constant 0 : i32
    %c0_i32_0 = arith.constant 0 : i32
    return %arg0, %c0_i32 : i32, i32
  }
}

</mosaic_0001>

<bundles_post_ra>
// kernel: tpu_custom_call.1
= control target key start
LH: loop header
LB: loop body
LE: loop exit
PB: predicated region body
PF: predicated region fallthrough
CT: control target
= control target key end

     0   :  { %9 = vsyncpa [#allocation3], 0  ;;  %s546_s0 = inlined_call_operand.vmem [shape: s32[8,1], index: 0, kind: input, shape index: {}]   ;;  %s547_s1 = inlined_call_operand.vmem [shape: bf16[8,128], index: 1, kind: input, shape index: {}]   ;;  %s548_s2 = inlined_call_operand.hbm [shape: bf16[128,512], index: 2, kind: input, shape index: {}]   ;;  %s549_s3 = inlined_call_operand.vmem [shape: f32[1,128], index: 3, kind: input, shape index: {}]   ;;  %s550_s4 = inlined_call_operand.hbm [shape: f32[8,128], index: 4, kind: output, shape index: {}]  }
   0x1   :  { %10 = vsyncpa [#allocation4], 0  ;;  %s493_s15 = smov [#allocation2]  }
   0x2   :  { %s20_s16 = sshll.u32 %s493_s15, 4  ;;  %s21_s16 = int_to_ptr.vmem [resolvable:$true] %s20_s16 }
   0x3   :  { %s457_s17 = scalar_lea.vmem %s21_s16, 4096  ;;  %p462_p1 = scmp.lt.s32.totalorder %s21_s16, %s21_s16 }
   0x4   :  { %p458_p0 = scmp.ne.s32.totalorder %s21_s16, %s457_s17  ;;  %p463_p2 = scmp.lt.s32.totalorder %s457_s17, %s457_s17 }
   0x6   :  { %p464_p3 = por %p463_p2, %p462_p1 }
   0x8   :  { %p465_p4 = pnand %p464_p3, %p458_p0 }
   0xa   :  { %468 = shalt.err (!%p465_p4)
}
   0xb   :  { %s494_s18 = smov 256   ;;  %s495_s19 = smov 16  }
   0xc   :  { %26 = dma.hbm_to_vmem [thread:$0]  %s548_s2, 4096, %s21_s16, [#allocation3], %s494_s18, %s494_s18, %s495_s19  }
   0xd   :  { %489 = dma.done.wait [#allocation3], 4096  }
   0xe   :  { %490 = vsyncadd [#allocation3], 4294963200  ;;  %v496_v0 = vmov 0   ;;  %v401_v1 = vld [vmem:[#allocation2 + $0xe4] ss:$16 sps:$4 sm:$0xff]  }
   0xf   :  { %163 = vmatprep.mubr.bf16.mxu0 %v496_v0  ;;  %314 = vmatprep.mubr.bf16.mxu1 %v496_v0  ;;  %v403_v2 = vld [vmem:[#allocation2 + $0xec] ss:$16 sps:$4 sm:$0xff]   ;;  %v405_v3 = vld [vmem:[#allocation2 + $0xe0] ss:$16 sps:$4 sm:$0xff]   ;;  %v406_v4 = vld [vmem:[#allocation2 + $0xe8] ss:$16 sps:$4 sm:$0xff]  }
  0x10   :  { %399 = vset.pattern.permute.xlu0 %v496_v0  ;;  %400 = vset.pattern.permute.xlu1 %v496_v0  ;;  %v407_v5 = vld [vmem:[#allocation2 + $0xc4] ss:$16 sps:$4 sm:$0xff]   ;;  %v409_v6 = vld [vmem:[#allocation2 + $0xcc] ss:$16 sps:$4 sm:$0xff]   ;;  %v411_v7 = vld [vmem:[#allocation2 + $0xc0] ss:$16 sps:$4 sm:$0xff]  }
  0x11   :  { %131 = vmatprep.subr.bf16.mxu0 %v401_v1  ;;  %282 = vmatprep.subr.bf16.mxu1 %v403_v2  ;;  %v412_v8 = vld [vmem:[#allocation2 + $0xc8] ss:$16 sps:$4 sm:$0xff]   ;;  %v413_v9 = vld [vmem:[#allocation2 + $0xa4] ss:$16 sps:$4 sm:$0xff]   ;;  %v415_v10 = vld [vmem:[#allocation2 + $0xac] ss:$16 sps:$4 sm:$0xff]  }
  0x12   :  { %132 = vmatpush1.bf16.msra.mxu0 %v405_v3  ;;  %283 = vmatpush1.bf16.msra.mxu1 %v406_v4  ;;  %v417_v11 = vld [vmem:[#allocation2 + $0xa0] ss:$16 sps:$4 sm:$0xff]   ;;  %v418_v12 = vld [vmem:[#allocation2 + $0xa8] ss:$16 sps:$4 sm:$0xff]   ;;  %v419_v13 = vld [vmem:[#allocation2 + $0x84] ss:$16 sps:$4 sm:$0xff]  }
  0x13   :  { %133 = vmatprep.subr.bf16.mxu0 %v407_v5  ;;  %284 = vmatprep.subr.bf16.mxu1 %v409_v6  ;;  %v421_v14 = vld [vmem:[#allocation2 + $0x8c] ss:$16 sps:$4 sm:$0xff]   ;;  %v423_v15 = vld [vmem:[#allocation2 + $0x80] ss:$16 sps:$4 sm:$0xff]   ;;  %v424_v16 = vld [vmem:[#allocation2 + $0x88] ss:$16 sps:$4 sm:$0xff]  }
  0x14   :  { %v425_v17 = vld [vmem:[#allocation2 + $0x64] ss:$16 sps:$4 sm:$0xff]   ;;  %v427_v18 = vld [vmem:[#allocation2 + $0x6c] ss:$16 sps:$4 sm:$0xff]   ;;  %v429_v19 = vld [vmem:[#allocation2 + $0x60] ss:$16 sps:$4 sm:$0xff]  }
  0x15   :  { %v430_v20 = vld [vmem:[#allocation2 + $0x68] ss:$16 sps:$4 sm:$0xff]   ;;  %v431_v21 = vld [vmem:[#allocation2 + $0x44] ss:$16 sps:$4 sm:$0xff]   ;;  %v433_v22 = vld [vmem:[#allocation2 + $0x4c] ss:$16 sps:$4 sm:$0xff]  }
  0x16   :  { %134 = vmatpush1.bf16.msra.mxu0 %v411_v7  ;;  %285 = vmatpush1.bf16.msra.mxu1 %v412_v8  ;;  %v435_v23 = vld [vmem:[#allocation2 + $0x40] ss:$16 sps:$4 sm:$0xff]   ;;  %v436_v24 = vld [vmem:[#allocation2 + $0x48] ss:$16 sps:$4 sm:$0xff]   ;;  %v437_v25 = vld [vmem:[#allocation2 + $0x24] ss:$16 sps:$4 sm:$0xff]  }
  0x17   :  { %135 = vmatprep.subr.bf16.mxu0 %v413_v9  ;;  %286 = vmatprep.subr.bf16.mxu1 %v415_v10  ;;  %v439_v26 = vld [vmem:[#allocation2 + $0x2c] ss:$16 sps:$4 sm:$0xff]   ;;  %v34_v27 = vld [vmem:[%s546_s0] sm:$0xff]  ;;  %v442_v31 = vld [vmem:[#allocation2 + $0x28] ss:$16 sps:$4 sm:$0xff]  }
  0x18   :  { %vm172_vm0 = vcmp.eq.s32.totalorder %v34_v27, 0  ;;  %vm323_vm1 = vcmp.eq.s32.totalorder %v34_v27, 2  ;;  %v441_v30 = vld [vmem:[#allocation2 + $0x20] ss:$16 sps:$4 sm:$0xff]   ;;  %vm179_vm2 = vcmp.eq.s32.totalorder %v34_v27, 1  ;;  %vm330_vm3 = vcmp.eq.s32.totalorder %v34_v27, 3 }
  0x19   :  { %v173_v28 = vsel %vm172_vm0, 1, %v496_v0  ;;  %v324_v29 = vsel %vm323_vm1, 1, %v496_v0  ;;  %v443_v32 = vld [vmem:[#allocation2 + $0x4] ss:$16 sps:$4 sm:$0xff]   ;;  %v445_v33 = vld [vmem:[#allocation2 + $0xc] ss:$16 sps:$4 sm:$0xff]  }
  0x1a   :  { %136 = vmatpush1.bf16.msra.mxu0 %v417_v11  ;;  %287 = vmatpush1.bf16.msra.mxu1 %v418_v12  ;;  %v180_v34 = vsel %vm179_vm2, 1, %v496_v0  ;;  %v331_v35 = vsel %vm330_vm3, 1, %v496_v0  ;;  %v447_v36 = vld [vmem:[#allocation2] ss:$16 sps:$4 sm:$0xff]   ;;  %v448_v37 = vld [vmem:[#allocation2 + $0x8] ss:$16 sps:$4 sm:$0xff]  }
  0x1b   :  { %137 = vmatprep.subr.bf16.mxu0 %v419_v13  ;;  %288 = vmatprep.subr.bf16.mxu1 %v421_v14  ;;  %v33_v38 = vld [vmem:[%s547_s1] sm:$0xf]  ;;  %s497_s1 = smov [#allocation5]  }
  0x1c   :  { %175 = vperm.xlu0 %399, %v173_v28   ;;  %326 = vperm.xlu1 %400, %v324_v29   ;;  %v393_v49 = vld [vmem:[%s549_s3] ss:$0 sm:$0xff]  ;;  %s352_s26 = sshll.u32 %s497_s1, 4  ;;  %s353_s26 = int_to_ptr.vmem [resolvable:$true] %s352_s26 }
  0x1d   :  { %s469_s27 = scalar_lea.vmem %s353_s26, 128  ;;  %p474_p6 = scmp.lt.s32.totalorder %s353_s26, %s353_s26 }
  0x1e   :  { %138 = vmatpush1.bf16.msra.mxu0 %v423_v15  ;;  %289 = vmatpush1.bf16.msra.mxu1 %v424_v16  ;;  %p470_p5 = scmp.ne.s32.totalorder %s353_s26, %s469_s27  ;;  %p475_p7 = scmp.lt.s32.totalorder %s469_s27, %s469_s27 }
  0x1f   :  { %139 = vmatprep.subr.bf16.mxu0 %v425_v17  ;;  %290 = vmatprep.subr.bf16.mxu1 %v427_v18 }
  0x20   :  { %182 = vperm.xlu0 %399, %v180_v34   ;;  %333 = vperm.xlu1 %400, %v331_v35   ;;  %p476_p8 = por %p475_p7, %p474_p6 }
  0x22   :  { %140 = vmatpush1.bf16.msra.mxu0 %v429_v19  ;;  %291 = vmatpush1.bf16.msra.mxu1 %v430_v20  ;;  %p477_p9 = pnand %p476_p8, %p470_p5 }
  0x23   :  { %141 = vmatprep.subr.bf16.mxu0 %v431_v21  ;;  %292 = vmatprep.subr.bf16.mxu1 %v433_v22 }
  0x26   :  { %142 = vmatpush1.bf16.msra.mxu0 %v435_v23  ;;  %293 = vmatpush1.bf16.msra.mxu1 %v436_v24 }
  0x27   :  { %143 = vmatprep.subr.bf16.mxu0 %v437_v25  ;;  %294 = vmatprep.subr.bf16.mxu1 %v439_v26 }
  0x2a   :  { %144 = vmatpush1.bf16.msra.mxu0 %v441_v30  ;;  %295 = vmatpush1.bf16.msra.mxu1 %v442_v31 }
  0x2b   :  { %145 = vmatprep.subr.bf16.mxu0 %v443_v32  ;;  %296 = vmatprep.subr.bf16.mxu1 %v445_v33 }
  0x2e   :  { %146 = vmatpush1.bf16.msra.mxu0 %v447_v36  ;;  %297 = vmatpush1.bf16.msra.mxu1 %v448_v37 }
  0x31   :  { %164 = vmatmul.mubr.bf16.vlgmr.msra.gmra.mxu0 %v33_v38  ;;  %315 = vmatmul.mubr.bf16.vlgmr.msra.gmra.mxu1 %v33_v38 }
  0x97   :  { %v176_v39 = vpop.permute.xlu0 %175  ;;  %v327_v40 = vpop.permute.xlu1 %326 }
  0x98   :  { %vm177_vm4 = vcmp.eq.s32.totalorder %v176_v39, 1  ;;  %vm328_vm6 = vcmp.eq.s32.totalorder %v327_v40, 1 }
  0x9b   :  { %v183_v41 = vpop.permute.xlu0 %182  ;;  %v334_v44 = vpop.permute.xlu1 %333 }
  0x9c   :  { %vm184_vm5 = vcmp.eq.s32.totalorder %v183_v41, 1  ;;  %vm335_vm7 = vcmp.eq.s32.totalorder %v334_v44, 1 }
  0xf1   :  { %v165_v42 = vpop.f32.mrf.mxu0  ;;  %v316_v43 = vpop.f32.mrf.mxu1 }
  0xf2   :  { %v178_v45 = vsel %vm177_vm4, %v165_v42, 0.0 }
  0xf3   :  { %v167_v46 = vpop.f32.mrf.mxu0  ;;  %v318_v47 = vpop.f32.mrf.mxu1 }
  0xf4   :  { %v185_v48 = vsel %vm184_vm5, %v167_v46, %v178_v45 }
  0xf5   :  { %v329_v50 = vsel %vm328_vm6, %v316_v43, %v185_v48  ;;  %v169_v51 = vpop.f32.mrf.mxu0  ;;  %v320_v52 = vpop.f32.mrf.mxu1 }
  0xf6   :  { %v336_v53 = vsel %vm335_vm7, %v318_v47, %v329_v50 }
  0xf7   :  { %v344_v54 = vadd.f32 %v393_v49, %v336_v53  ;;  %v170_v55 = vpop.f32.mrf.mxu0  ;;  %v321_v56 = vpop.f32.mrf.mxu1 }
  0xf9   :  { %345 = vst [vmem:[#allocation5] sm:$0xff] %v344_v54 }
  0xfa   :  { %480 = shalt.err (!%p477_p9)
}
  0xfb   :  { %355 = dma.vmem_to_hbm [thread:$0]  %s353_s26, 128, %s550_s4, [#allocation4]  }
  0xfc   :  { %491 = dma.done.wait [#allocation4], 128  }
  0xfd   :  { %492 = vsyncadd [#allocation4], 4294967168 }
  0xfe   :  { %359 = vsyncpa [#allocation3], 1 }
  0xff   :  { %360 = vsyncpa [#allocation4], 1 }

</bundles_post_ra>
